<compile_context>
chip_gen: v5e
topology: v5e:2x2
jax: 0.10.0
libtpu: 0.0.40
codegen_flags: <defaults>
</compile_context>

<pallas_src>
import functools

import jax
import jax.numpy as jnp
from jax.experimental import pallas as pl
from jax.experimental.pallas import tpu as pltpu

LANE = 128      # vreg lane width
SUBLANE = 8     # vreg sublane width
NEG_MASK = -1e30  # finite "minus infinity" for padded class lanes


def _round_up(n, m):
    return ((n + m - 1) // m) * m


def rnn4_kernel(h0_ref,      # [Bp, Hp]      f32  initial hidden
                w_big_ref,   # [Hp, Hp+Op]   bf16 fused [ w_i2h | W_out ]
                b_h_ref,     # [1, Hp]       f32  i2h bias
                b_o_ref,     # [1, Op]       f32  folded output bias (pad lanes = -1e30)
                out_ref,     # [T, Bp, Op]   f32  per-step log-probs
                hfin_ref,    # [Bp, Hp]      f32  final hidden
                *, steps, hp):
    bp = h0_ref.shape[0]
    op = b_o_ref.shape[-1]

    # Hoist weight/bias loads and broadcasts out of the time loop (JAX does not
    # CSE broadcast_in_dim; per-step reloads would occupy vld slots).
    w_big = w_big_ref[...]
    b_h = jnp.broadcast_to(b_h_ref[...], (bp, hp))
    b_o = jnp.broadcast_to(b_o_ref[...], (bp, op))

    def step(t, h):
        # Single MXU pass per step: columns [:Hp] -> hidden', columns [Hp:] -> logits.
        z = jnp.dot(h.astype(w_big.dtype), w_big,
                    preferred_element_type=jnp.float32)
        new_h = z[:, :hp] + b_h
        o2 = z[:, hp:] + b_o          # padded class lanes pushed to -1e30 by the bias

        # Dropout(p=0.1) is identity in eval/inference.
        # TODO(synk): train-mode stochastic dropout (pltpu.prng_random_bits mask,
        # scaled by 1/(1-p)) not emitted here.

        m = jnp.max(o2, axis=1, keepdims=True)
        s = o2 - m
        lse = jnp.log(jnp.sum(jnp.exp(s), axis=1, keepdims=True))
        out_ref[t] = s - lse
        return new_h

    # Whole recurrence in one invocation; unrolled so independent work of
    # adjacent steps can interleave.
    hfin_ref[...] = jax.lax.fori_loop(0, steps, step, h0_ref[...],
                                      unroll=min(steps, 8))


def _fold_params(params):
    """Algebraic fold of the output path, composed in f32 (cast to bf16 once later).

      out2 = o2o(cat(h', i2o(h'))) = h' @ W_eff + b_eff
           = h @ (w_i2h @ W_eff) + (b_i2h @ W_eff + b_eff) = h @ W_out + b_out
    """
    f32 = jnp.float32
    H = params["w_i2h"].shape[0]
    w_i2h = params["w_i2h"].astype(f32)
    b_i2h = params["b_i2h"].astype(f32)
    w_i2o = params["w_i2o"].astype(f32)
    b_i2o = params["b_i2o"].astype(f32)
    w_o2o = params["w_o2o"].astype(f32)
    b_o2o = params["b_o2o"].astype(f32)

    w_o2o_h, w_o2o_o = w_o2o[:H], w_o2o[H:]
    w_eff = w_o2o_h + w_i2o @ w_o2o_o            # [H, O]
    b_eff = b_o2o + b_i2o @ w_o2o_o              # [1, O]
    w_out = w_i2h @ w_eff                        # [H, O]
    b_out = b_i2h @ w_eff + b_eff                # [1, O]
    return w_i2h, b_i2h, w_out, b_out


@functools.partial(jax.jit, static_argnames=("steps",))
def rnn4_forward(hidden, params, steps=1):
    """hidden: [B, H] -> (log_probs [steps, B, O], final_hidden [B, H]).

    steps=1 reproduces one call of RNN4.forward; steps>1 runs the recurrence
    entirely inside the kernel (weights VMEM-resident the whole time)."""
    B, H = hidden.shape
    O = params["b_o2o"].shape[-1]

    Bp = max(_round_up(B, SUBLANE), SUBLANE)
    Hp = _round_up(H, LANE)
    Op = _round_up(O, LANE)

    w_i2h, b_i2h, w_out, b_out = _fold_params(params)

    def pad2(a, rows, cols, fill=0.0):
        return jnp.pad(a, ((0, rows - a.shape[0]), (0, cols - a.shape[1])),
                       constant_values=fill)

    h0 = pad2(hidden.astype(jnp.float32), Bp, Hp)
    # One fused RHS [Hp, Hp+Op]: a single 128x256 MXU push per step on the
    # 256-wide v6e/v7x MXU (on v5e, two 128x128 dots would be preferable).
    w_big = jnp.concatenate([pad2(w_i2h, Hp, Hp), pad2(w_out, Hp, Op)],
                            axis=1).astype(jnp.bfloat16)
    b_h = pad2(b_i2h, 1, Hp)
    b_o = pad2(b_out, 1, Op, fill=NEG_MASK)   # bias masks padded classes; no in-kernel iota/where

    vmem = pl.BlockSpec(memory_space=pltpu.MemorySpace.VMEM)
    out_pad, h_pad = pl.pallas_call(
        functools.partial(rnn4_kernel, steps=steps, hp=Hp),
        out_shape=(
            jax.ShapeDtypeStruct((steps, Bp, Op), jnp.float32),
            jax.ShapeDtypeStruct((Bp, Hp), jnp.float32),
        ),
        in_specs=[vmem, vmem, vmem, vmem],
        out_specs=(vmem, vmem),
    )(h0, w_big, b_h, b_o)
    # TODO(synk): for very long sequences, chunk T with an "arbitrary" grid axis
    # (Tc a few hundred per chunk) so the output block stays bounded in VMEM.
    return out_pad[:, :B, :O], h_pad[:B, :H]


def init_params(key, hidden_size, output_size):
    """nn.Linear-style init; weights stored pre-transposed [in, out] in f32
    (master copy). The wrapper folds in f32 and casts to bf16 once."""
    ks = jax.random.split(key, 6)

    def linear(kw, kb, fan_in, fan_out):
        bound = 1.0 / jnp.sqrt(jnp.float32(fan_in))
        w = jax.random.uniform(kw, (fan_in, fan_out), jnp.float32, -bound, bound)
        b = jax.random.uniform(kb, (1, fan_out), jnp.float32, -bound, bound)
        return w, b

    w_i2h, b_i2h = linear(ks[0], ks[1], hidden_size, hidden_size)
    w_i2o, b_i2o = linear(ks[2], ks[3], hidden_size, output_size)
    w_o2o, b_o2o = linear(ks[4], ks[5], hidden_size + output_size, output_size)
    return {"w_i2h": w_i2h, "b_i2h": b_i2h,
            "w_i2o": w_i2o, "b_i2o": b_i2o,
            "w_o2o": w_o2o, "b_o2o": b_o2o}


def rnn4_reference_folded(hidden, params, steps):
    """Pure-JAX mirror of the kernel math (folded bf16 weights, f32 accumulation)."""
    w_i2h, b_i2h, w_out, b_out = _fold_params(params)
    w_i2h_b = w_i2h.astype(jnp.bfloat16)
    w_out_b = w_out.astype(jnp.bfloat16)
    h = hidden.astype(jnp.float32)
    outs = []
    for _ in range(steps):
        hb = h.astype(jnp.bfloat16)
        new_h = jnp.dot(hb, w_i2h_b, preferred_element_type=jnp.float32) + b_i2h
        o2 = jnp.dot(hb, w_out_b, preferred_element_type=jnp.float32) + b_out
        outs.append(jax.nn.log_softmax(o2, axis=1))
        h = new_h
    return jnp.stack(outs), h


def rnn4_reference_pytorch(hidden, params, steps):
    """Original (un-folded) RNN4 structure in f32: i2h -> i2o -> cat -> o2o ->
    LogSoftmax; Dropout(p=0.1) is identity in eval."""
    f32 = jnp.float32
    w_i2h, b_i2h = params["w_i2h"].astype(f32), params["b_i2h"].astype(f32)
    w_i2o, b_i2o = params["w_i2o"].astype(f32), params["b_i2o"].astype(f32)
    w_o2o, b_o2o = params["w_o2o"].astype(f32), params["b_o2o"].astype(f32)
    h = hidden.astype(f32)
    outs = []
    for _ in range(steps):
        h = h @ w_i2h + b_i2h
        o1 = h @ w_i2o + b_i2o
        o2 = jnp.concatenate([h, o1], axis=1) @ w_o2o + b_o2o
        outs.append(jax.nn.log_softmax(o2, axis=1))
    return jnp.stack(outs), h


if __name__ == "__main__":
    B = 2
    input_size, hidden_size, output_size = 16, 32, 18  # input_size unused by RNN4.forward
    T = 8                                              # timesteps run inside one kernel call

    key = jax.random.PRNGKey(0)
    k_h, k_p = jax.random.split(key, 2)
    hidden = jax.random.normal(k_h, (B, hidden_size), jnp.float32)
    params = init_params(k_p, hidden_size, output_size)

    log_probs, new_hidden = rnn4_forward(hidden, params, steps=T)
    jax.block_until_ready((log_probs, new_hidden))

    assert log_probs.shape == (T, B, output_size)
    assert new_hidden.shape == (B, hidden_size)
    assert bool(jnp.allclose(jnp.exp(log_probs).sum(axis=-1), 1.0, atol=1e-4))

    # Exact mirror of the kernel math (same folded bf16 weights).
    mir_out, mir_h = rnn4_reference_folded(hidden, params, T)
    assert bool(jnp.allclose(log_probs, mir_out, atol=1e-3, rtol=1e-3))
    assert bool(jnp.allclose(new_hidden, mir_h, atol=1e-3, rtol=1e-3))

    # Semantic check against the original piecewise f32 module structure; the
    # gap is bounded by bf16 weight rounding of the folded weights.
    ref_out, ref_h = rnn4_reference_pytorch(hidden, params, T)
    assert bool(jnp.allclose(log_probs, ref_out, atol=5e-2, rtol=5e-2))
    assert bool(jnp.allclose(new_hidden, ref_h, atol=5e-2, rtol=5e-2))

    # single-step call == one RNN4.forward(hidden)
    step_out, step_h = rnn4_forward(hidden, params, steps=1)
    jax.block_until_ready((step_out, step_h))
    assert step_out.shape == (1, B, output_size) and step_h.shape == (B, hidden_size)

    print("KERNEL_OK")
</pallas_src>

<mosaic_0001>
module attributes {stable_mosaic.version = 11 : i64} {
  func.func @rnn4_kernel(%arg0: memref<8x128xf32, #tpu.memory_space<vmem>>, %arg1: memref<128x256xbf16, #tpu.memory_space<vmem>>, %arg2: memref<1x128xf32, #tpu.memory_space<vmem>>, %arg3: memref<1x128xf32, #tpu.memory_space<vmem>>, %arg4: memref<8x8x128xf32, #tpu.memory_space<vmem>>, %arg5: memref<8x128xf32, #tpu.memory_space<vmem>>) attributes {dimension_semantics = [], scalar_prefetch = 0 : i64, scratch_operands = 0 : i64, tpu.core_type = #tpu.core_type<tc>} {
    %c0 = arith.constant 0 : index
    %c0_0 = arith.constant 0 : index
    %0 = vector.load %arg1[%c0, %c0_0] : memref<128x256xbf16, #tpu.memory_space<vmem>>, vector<128x256xbf16>
    %c0_1 = arith.constant 0 : index
    %c0_2 = arith.constant 0 : index
    %1 = vector.load %arg2[%c0_1, %c0_2] : memref<1x128xf32, #tpu.memory_space<vmem>>, vector<1x128xf32>
    %2 = vector.shape_cast %1 : vector<1x128xf32> to vector<1x128xf32>
    %3 = vector.broadcast %2 : vector<1x128xf32> to vector<8x128xf32>
    %c0_3 = arith.constant 0 : index
    %c0_4 = arith.constant 0 : index
    %4 = vector.load %arg3[%c0_3, %c0_4] : memref<1x128xf32, #tpu.memory_space<vmem>>, vector<1x128xf32>
    %5 = vector.shape_cast %4 : vector<1x128xf32> to vector<1x128xf32>
    %6 = vector.broadcast %5 : vector<1x128xf32> to vector<8x128xf32>
    %c0_5 = arith.constant 0 : index
    %c0_6 = arith.constant 0 : index
    %7 = vector.load %arg0[%c0_5, %c0_6] : memref<8x128xf32, #tpu.memory_space<vmem>>, vector<8x128xf32>
    %c0_i32 = arith.constant 0 : i32
    %8 = arith.truncf %7 : vector<8x128xf32> to vector<8x128xbf16>
    %cst = arith.constant dense<0.000000e+00> : vector<8x256xf32>
    %9 = tpu.matmul %8, %0, %cst {dimension_numbers = #tpu.dot_dimension_numbers<[1], [0], [0], [1], [0, 0, 1, 1], [], []>} : vector<8x128xbf16>, vector<128x256xbf16>, vector<8x256xf32> -> vector<8x256xf32>
    %10 = vector.extract_strided_slice %9 {offsets = [0, 0], sizes = [8, 128], strides = [1, 1]} : vector<8x256xf32> to vector<8x128xf32>
    %11 = arith.addf %10, %3 : vector<8x128xf32>
    %12 = vector.extract_strided_slice %9 {offsets = [0, 128], sizes = [8, 128], strides = [1, 1]} : vector<8x256xf32> to vector<8x128xf32>
    %13 = arith.addf %12, %6 : vector<8x128xf32>
    %cst_7 = arith.constant dense<0xFF800000> : vector<8xf32>
    %14 = vector.multi_reduction <maximumf>, %13, %cst_7 [1] : vector<8x128xf32> to vector<8xf32>
    %15 = vector.shape_cast %14 : vector<8xf32> to vector<8x1xf32>
    %16 = vector.broadcast %15 : vector<8x1xf32> to vector<8x128xf32>
    %17 = arith.subf %13, %16 : vector<8x128xf32>
    %18 = math.exp %17 : vector<8x128xf32>
    %cst_8 = arith.constant dense<0.000000e+00> : vector<8xf32>
    %19 = vector.multi_reduction <add>, %18, %cst_8 [1] : vector<8x128xf32> to vector<8xf32>
    %20 = vector.shape_cast %19 : vector<8xf32> to vector<8x1xf32>
    %21 = math.log %20 : vector<8x1xf32>
    %22 = vector.broadcast %21 : vector<8x1xf32> to vector<8x128xf32>
    %23 = arith.subf %17, %22 : vector<8x128xf32>
    %24 = arith.index_cast %c0_i32 : i32 to index
    %c0_9 = arith.constant 0 : index
    %c0_10 = arith.constant 0 : index
    %25 = vector.load %arg4[%24, %c0_9, %c0_10] : memref<8x8x128xf32, #tpu.memory_space<vmem>>, vector<1x8x128xf32>
    %26 = vector.shape_cast %25 : vector<1x8x128xf32> to vector<8x128xf32>
    %27 = vector.shape_cast %23 : vector<8x128xf32> to vector<1x8x128xf32>
    tpu.vector_store %arg4[%24, %c0_9, %c0_10], %27 {strides = array<i32>} : memref<8x8x128xf32, #tpu.memory_space<vmem>>, vector<1x8x128xf32>,
    %c1_i32 = arith.constant 1 : i32
    %28 = arith.truncf %11 : vector<8x128xf32> to vector<8x128xbf16>
    %cst_11 = arith.constant dense<0.000000e+00> : vector<8x256xf32>
    %29 = tpu.matmul %28, %0, %cst_11 {dimension_numbers = #tpu.dot_dimension_numbers<[1], [0], [0], [1], [0, 0, 1, 1], [], []>} : vector<8x128xbf16>, vector<128x256xbf16>, vector<8x256xf32> -> vector<8x256xf32>
    %30 = vector.extract_strided_slice %29 {offsets = [0, 0], sizes = [8, 128], strides = [1, 1]} : vector<8x256xf32> to vector<8x128xf32>
    %31 = arith.addf %30, %3 : vector<8x128xf32>
    %32 = vector.extract_strided_slice %29 {offsets = [0, 128], sizes = [8, 128], strides = [1, 1]} : vector<8x256xf32> to vector<8x128xf32>
    %33 = arith.addf %32, %6 : vector<8x128xf32>
    %cst_12 = arith.constant dense<0xFF800000> : vector<8xf32>
    %34 = vector.multi_reduction <maximumf>, %33, %cst_12 [1] : vector<8x128xf32> to vector<8xf32>
    %35 = vector.shape_cast %34 : vector<8xf32> to vector<8x1xf32>
    %36 = vector.broadcast %35 : vector<8x1xf32> to vector<8x128xf32>
    %37 = arith.subf %33, %36 : vector<8x128xf32>
    %38 = math.exp %37 : vector<8x128xf32>
    %cst_13 = arith.constant dense<0.000000e+00> : vector<8xf32>
    %39 = vector.multi_reduction <add>, %38, %cst_13 [1] : vector<8x128xf32> to vector<8xf32>
    %40 = vector.shape_cast %39 : vector<8xf32> to vector<8x1xf32>
    %41 = math.log %40 : vector<8x1xf32>
    %42 = vector.broadcast %41 : vector<8x1xf32> to vector<8x128xf32>
    %43 = arith.subf %37, %42 : vector<8x128xf32>
    %44 = arith.index_cast %c1_i32 : i32 to index
    %c0_14 = arith.constant 0 : index
    %c0_15 = arith.constant 0 : index
    %45 = vector.load %arg4[%44, %c0_14, %c0_15] : memref<8x8x128xf32, #tpu.memory_space<vmem>>, vector<1x8x128xf32>
    %46 = vector.shape_cast %45 : vector<1x8x128xf32> to vector<8x128xf32>
    %47 = vector.shape_cast %43 : vector<8x128xf32> to vector<1x8x128xf32>
    tpu.vector_store %arg4[%44, %c0_14, %c0_15], %47 {strides = array<i32>} : memref<8x8x128xf32, #tpu.memory_space<vmem>>, vector<1x8x128xf32>,
    %c2_i32 = arith.constant 2 : i32
    %48 = arith.truncf %31 : vector<8x128xf32> to vector<8x128xbf16>
    %cst_16 = arith.constant dense<0.000000e+00> : vector<8x256xf32>
    %49 = tpu.matmul %48, %0, %cst_16 {dimension_numbers = #tpu.dot_dimension_numbers<[1], [0], [0], [1], [0, 0, 1, 1], [], []>} : vector<8x128xbf16>, vector<128x256xbf16>, vector<8x256xf32> -> vector<8x256xf32>
    %50 = vector.extract_strided_slice %49 {offsets = [0, 0], sizes = [8, 128], strides = [1, 1]} : vector<8x256xf32> to vector<8x128xf32>
    %51 = arith.addf %50, %3 : vector<8x128xf32>
    %52 = vector.extract_strided_slice %49 {offsets = [0, 128], sizes = [8, 128], strides = [1, 1]} : vector<8x256xf32> to vector<8x128xf32>
    %53 = arith.addf %52, %6 : vector<8x128xf32>
    %cst_17 = arith.constant dense<0xFF800000> : vector<8xf32>
    %54 = vector.multi_reduction <maximumf>, %53, %cst_17 [1] : vector<8x128xf32> to vector<8xf32>
    %55 = vector.shape_cast %54 : vector<8xf32> to vector<8x1xf32>
    %56 = vector.broadcast %55 : vector<8x1xf32> to vector<8x128xf32>
    %57 = arith.subf %53, %56 : vector<8x128xf32>
    %58 = math.exp %57 : vector<8x128xf32>
    %cst_18 = arith.constant dense<0.000000e+00> : vector<8xf32>
    %59 = vector.multi_reduction <add>, %58, %cst_18 [1] : vector<8x128xf32> to vector<8xf32>
    %60 = vector.shape_cast %59 : vector<8xf32> to vector<8x1xf32>
    %61 = math.log %60 : vector<8x1xf32>
    %62 = vector.broadcast %61 : vector<8x1xf32> to vector<8x128xf32>
    %63 = arith.subf %57, %62 : vector<8x128xf32>
    %64 = arith.index_cast %c2_i32 : i32 to index
    %c0_19 = arith.constant 0 : index
    %c0_20 = arith.constant 0 : index
    %65 = vector.load %arg4[%64, %c0_19, %c0_20] : memref<8x8x128xf32, #tpu.memory_space<vmem>>, vector<1x8x128xf32>
    %66 = vector.shape_cast %65 : vector<1x8x128xf32> to vector<8x128xf32>
    %67 = vector.shape_cast %63 : vector<8x128xf32> to vector<1x8x128xf32>
    tpu.vector_store %arg4[%64, %c0_19, %c0_20], %67 {strides = array<i32>} : memref<8x8x128xf32, #tpu.memory_space<vmem>>, vector<1x8x128xf32>,
    %c3_i32 = arith.constant 3 : i32
    %68 = arith.truncf %51 : vector<8x128xf32> to vector<8x128xbf16>
    %cst_21 = arith.constant dense<0.000000e+00> : vector<8x256xf32>
    %69 = tpu.matmul %68, %0, %cst_21 {dimension_numbers = #tpu.dot_dimension_numbers<[1], [0], [0], [1], [0, 0, 1, 1], [], []>} : vector<8x128xbf16>, vector<128x256xbf16>, vector<8x256xf32> -> vector<8x256xf32>
    %70 = vector.extract_strided_slice %69 {offsets = [0, 0], sizes = [8, 128], strides = [1, 1]} : vector<8x256xf32> to vector<8x128xf32>
    %71 = arith.addf %70, %3 : vector<8x128xf32>
    %72 = vector.extract_strided_slice %69 {offsets = [0, 128], sizes = [8, 128], strides = [1, 1]} : vector<8x256xf32> to vector<8x128xf32>
    %73 = arith.addf %72, %6 : vector<8x128xf32>
    %cst_22 = arith.constant dense<0xFF800000> : vector<8xf32>
    %74 = vector.multi_reduction <maximumf>, %73, %cst_22 [1] : vector<8x128xf32> to vector<8xf32>
    %75 = vector.shape_cast %74 : vector<8xf32> to vector<8x1xf32>
    %76 = vector.broadcast %75 : vector<8x1xf32> to vector<8x128xf32>
    %77 = arith.subf %73, %76 : vector<8x128xf32>
    %78 = math.exp %77 : vector<8x128xf32>
    %cst_23 = arith.constant dense<0.000000e+00> : vector<8xf32>
    %79 = vector.multi_reduction <add>, %78, %cst_23 [1] : vector<8x128xf32> to vector<8xf32>
    %80 = vector.shape_cast %79 : vector<8xf32> to vector<8x1xf32>
    %81 = math.log %80 : vector<8x1xf32>
    %82 = vector.broadcast %81 : vector<8x1xf32> to vector<8x128xf32>
    %83 = arith.subf %77, %82 : vector<8x128xf32>
    %84 = arith.index_cast %c3_i32 : i32 to index
    %c0_24 = arith.constant 0 : index
    %c0_25 = arith.constant 0 : index
    %85 = vector.load %arg4[%84, %c0_24, %c0_25] : memref<8x8x128xf32, #tpu.memory_space<vmem>>, vector<1x8x128xf32>
    %86 = vector.shape_cast %85 : vector<1x8x128xf32> to vector<8x128xf32>
    %87 = vector.shape_cast %83 : vector<8x128xf32> to vector<1x8x128xf32>
    tpu.vector_store %arg4[%84, %c0_24, %c0_25], %87 {strides = array<i32>} : memref<8x8x128xf32, #tpu.memory_space<vmem>>, vector<1x8x128xf32>,
    %c4_i32 = arith.constant 4 : i32
    %88 = arith.truncf %71 : vector<8x128xf32> to vector<8x128xbf16>
    %cst_26 = arith.constant dense<0.000000e+00> : vector<8x256xf32>
    %89 = tpu.matmul %88, %0, %cst_26 {dimension_numbers = #tpu.dot_dimension_numbers<[1], [0], [0], [1], [0, 0, 1, 1], [], []>} : vector<8x128xbf16>, vector<128x256xbf16>, vector<8x256xf32> -> vector<8x256xf32>
    %90 = vector.extract_strided_slice %89 {offsets = [0, 0], sizes = [8, 128], strides = [1, 1]} : vector<8x256xf32> to vector<8x128xf32>
    %91 = arith.addf %90, %3 : vector<8x128xf32>
    %92 = vector.extract_strided_slice %89 {offsets = [0, 128], sizes = [8, 128], strides = [1, 1]} : vector<8x256xf32> to vector<8x128xf32>
    %93 = arith.addf %92, %6 : vector<8x128xf32>
    %cst_27 = arith.constant dense<0xFF800000> : vector<8xf32>
    %94 = vector.multi_reduction <maximumf>, %93, %cst_27 [1] : vector<8x128xf32> to vector<8xf32>
    %95 = vector.shape_cast %94 : vector<8xf32> to vector<8x1xf32>
    %96 = vector.broadcast %95 : vector<8x1xf32> to vector<8x128xf32>
    %97 = arith.subf %93, %96 : vector<8x128xf32>
    %98 = math.exp %97 : vector<8x128xf32>
    %cst_28 = arith.constant dense<0.000000e+00> : vector<8xf32>
    %99 = vector.multi_reduction <add>, %98, %cst_28 [1] : vector<8x128xf32> to vector<8xf32>
    %100 = vector.shape_cast %99 : vector<8xf32> to vector<8x1xf32>
    %101 = math.log %100 : vector<8x1xf32>
    %102 = vector.broadcast %101 : vector<8x1xf32> to vector<8x128xf32>
    %103 = arith.subf %97, %102 : vector<8x128xf32>
    %104 = arith.index_cast %c4_i32 : i32 to index
    %c0_29 = arith.constant 0 : index
    %c0_30 = arith.constant 0 : index
    %105 = vector.load %arg4[%104, %c0_29, %c0_30] : memref<8x8x128xf32, #tpu.memory_space<vmem>>, vector<1x8x128xf32>
    %106 = vector.shape_cast %105 : vector<1x8x128xf32> to vector<8x128xf32>
    %107 = vector.shape_cast %103 : vector<8x128xf32> to vector<1x8x128xf32>
    tpu.vector_store %arg4[%104, %c0_29, %c0_30], %107 {strides = array<i32>} : memref<8x8x128xf32, #tpu.memory_space<vmem>>, vector<1x8x128xf32>,
    %c5_i32 = arith.constant 5 : i32
    %108 = arith.truncf %91 : vector<8x128xf32> to vector<8x128xbf16>
    %cst_31 = arith.constant dense<0.000000e+00> : vector<8x256xf32>
    %109 = tpu.matmul %108, %0, %cst_31 {dimension_numbers = #tpu.dot_dimension_numbers<[1], [0], [0], [1], [0, 0, 1, 1], [], []>} : vector<8x128xbf16>, vector<128x256xbf16>, vector<8x256xf32> -> vector<8x256xf32>
    %110 = vector.extract_strided_slice %109 {offsets = [0, 0], sizes = [8, 128], strides = [1, 1]} : vector<8x256xf32> to vector<8x128xf32>
    %111 = arith.addf %110, %3 : vector<8x128xf32>
    %112 = vector.extract_strided_slice %109 {offsets = [0, 128], sizes = [8, 128], strides = [1, 1]} : vector<8x256xf32> to vector<8x128xf32>
    %113 = arith.addf %112, %6 : vector<8x128xf32>
    %cst_32 = arith.constant dense<0xFF800000> : vector<8xf32>
    %114 = vector.multi_reduction <maximumf>, %113, %cst_32 [1] : vector<8x128xf32> to vector<8xf32>
    %115 = vector.shape_cast %114 : vector<8xf32> to vector<8x1xf32>
    %116 = vector.broadcast %115 : vector<8x1xf32> to vector<8x128xf32>
    %117 = arith.subf %113, %116 : vector<8x128xf32>
    %118 = math.exp %117 : vector<8x128xf32>
    %cst_33 = arith.constant dense<0.000000e+00> : vector<8xf32>
    %119 = vector.multi_reduction <add>, %118, %cst_33 [1] : vector<8x128xf32> to vector<8xf32>
    %120 = vector.shape_cast %119 : vector<8xf32> to vector<8x1xf32>
    %121 = math.log %120 : vector<8x1xf32>
    %122 = vector.broadcast %121 : vector<8x1xf32> to vector<8x128xf32>
    %123 = arith.subf %117, %122 : vector<8x128xf32>
    %124 = arith.index_cast %c5_i32 : i32 to index
    %c0_34 = arith.constant 0 : index
    %c0_35 = arith.constant 0 : index
    %125 = vector.load %arg4[%124, %c0_34, %c0_35] : memref<8x8x128xf32, #tpu.memory_space<vmem>>, vector<1x8x128xf32>
    %126 = vector.shape_cast %125 : vector<1x8x128xf32> to vector<8x128xf32>
    %127 = vector.shape_cast %123 : vector<8x128xf32> to vector<1x8x128xf32>
    tpu.vector_store %arg4[%124, %c0_34, %c0_35], %127 {strides = array<i32>} : memref<8x8x128xf32, #tpu.memory_space<vmem>>, vector<1x8x128xf32>,
    %c6_i32 = arith.constant 6 : i32
    %128 = arith.truncf %111 : vector<8x128xf32> to vector<8x128xbf16>
    %cst_36 = arith.constant dense<0.000000e+00> : vector<8x256xf32>
    %129 = tpu.matmul %128, %0, %cst_36 {dimension_numbers = #tpu.dot_dimension_numbers<[1], [0], [0], [1], [0, 0, 1, 1], [], []>} : vector<8x128xbf16>, vector<128x256xbf16>, vector<8x256xf32> -> vector<8x256xf32>
    %130 = vector.extract_strided_slice %129 {offsets = [0, 0], sizes = [8, 128], strides = [1, 1]} : vector<8x256xf32> to vector<8x128xf32>
    %131 = arith.addf %130, %3 : vector<8x128xf32>
    %132 = vector.extract_strided_slice %129 {offsets = [0, 128], sizes = [8, 128], strides = [1, 1]} : vector<8x256xf32> to vector<8x128xf32>
    %133 = arith.addf %132, %6 : vector<8x128xf32>
    %cst_37 = arith.constant dense<0xFF800000> : vector<8xf32>
    %134 = vector.multi_reduction <maximumf>, %133, %cst_37 [1] : vector<8x128xf32> to vector<8xf32>
    %135 = vector.shape_cast %134 : vector<8xf32> to vector<8x1xf32>
    %136 = vector.broadcast %135 : vector<8x1xf32> to vector<8x128xf32>
    %137 = arith.subf %133, %136 : vector<8x128xf32>
    %138 = math.exp %137 : vector<8x128xf32>
    %cst_38 = arith.constant dense<0.000000e+00> : vector<8xf32>
    %139 = vector.multi_reduction <add>, %138, %cst_38 [1] : vector<8x128xf32> to vector<8xf32>
    %140 = vector.shape_cast %139 : vector<8xf32> to vector<8x1xf32>
    %141 = math.log %140 : vector<8x1xf32>
    %142 = vector.broadcast %141 : vector<8x1xf32> to vector<8x128xf32>
    %143 = arith.subf %137, %142 : vector<8x128xf32>
    %144 = arith.index_cast %c6_i32 : i32 to index
    %c0_39 = arith.constant 0 : index
    %c0_40 = arith.constant 0 : index
    %145 = vector.load %arg4[%144, %c0_39, %c0_40] : memref<8x8x128xf32, #tpu.memory_space<vmem>>, vector<1x8x128xf32>
    %146 = vector.shape_cast %145 : vector<1x8x128xf32> to vector<8x128xf32>
    %147 = vector.shape_cast %143 : vector<8x128xf32> to vector<1x8x128xf32>
    tpu.vector_store %arg4[%144, %c0_39, %c0_40], %147 {strides = array<i32>} : memref<8x8x128xf32, #tpu.memory_space<vmem>>, vector<1x8x128xf32>,
    %c7_i32 = arith.constant 7 : i32
    %148 = arith.truncf %131 : vector<8x128xf32> to vector<8x128xbf16>
    %cst_41 = arith.constant dense<0.000000e+00> : vector<8x256xf32>
    %149 = tpu.matmul %148, %0, %cst_41 {dimension_numbers = #tpu.dot_dimension_numbers<[1], [0], [0], [1], [0, 0, 1, 1], [], []>} : vector<8x128xbf16>, vector<128x256xbf16>, vector<8x256xf32> -> vector<8x256xf32>
    %150 = vector.extract_strided_slice %149 {offsets = [0, 0], sizes = [8, 128], strides = [1, 1]} : vector<8x256xf32> to vector<8x128xf32>
    %151 = arith.addf %150, %3 : vector<8x128xf32>
    %152 = vector.extract_strided_slice %149 {offsets = [0, 128], sizes = [8, 128], strides = [1, 1]} : vector<8x256xf32> to vector<8x128xf32>
    %153 = arith.addf %152, %6 : vector<8x128xf32>
    %cst_42 = arith.constant dense<0xFF800000> : vector<8xf32>
    %154 = vector.multi_reduction <maximumf>, %153, %cst_42 [1] : vector<8x128xf32> to vector<8xf32>
    %155 = vector.shape_cast %154 : vector<8xf32> to vector<8x1xf32>
    %156 = vector.broadcast %155 : vector<8x1xf32> to vector<8x128xf32>
    %157 = arith.subf %153, %156 : vector<8x128xf32>
    %158 = math.exp %157 : vector<8x128xf32>
    %cst_43 = arith.constant dense<0.000000e+00> : vector<8xf32>
    %159 = vector.multi_reduction <add>, %158, %cst_43 [1] : vector<8x128xf32> to vector<8xf32>
    %160 = vector.shape_cast %159 : vector<8xf32> to vector<8x1xf32>
    %161 = math.log %160 : vector<8x1xf32>
    %162 = vector.broadcast %161 : vector<8x1xf32> to vector<8x128xf32>
    %163 = arith.subf %157, %162 : vector<8x128xf32>
    %164 = arith.index_cast %c7_i32 : i32 to index
    %c0_44 = arith.constant 0 : index
    %c0_45 = arith.constant 0 : index
    %165 = vector.load %arg4[%164, %c0_44, %c0_45] : memref<8x8x128xf32, #tpu.memory_space<vmem>>, vector<1x8x128xf32>
    %166 = vector.shape_cast %165 : vector<1x8x128xf32> to vector<8x128xf32>
    %167 = vector.shape_cast %163 : vector<8x128xf32> to vector<1x8x128xf32>
    tpu.vector_store %arg4[%164, %c0_44, %c0_45], %167 {strides = array<i32>} : memref<8x8x128xf32, #tpu.memory_space<vmem>>, vector<1x8x128xf32>,
    %c8_i32 = arith.constant 8 : i32
    %c0_46 = arith.constant 0 : index
    %c0_47 = arith.constant 0 : index
    %168 = vector.load %arg5[%c0_46, %c0_47] : memref<8x128xf32, #tpu.memory_space<vmem>>, vector<8x128xf32>
    tpu.vector_store %arg5[%c0_46, %c0_47], %151 {strides = array<i32>} : memref<8x128xf32, #tpu.memory_space<vmem>>, vector<8x128xf32>,
    return
  }
}

</mosaic_0001>

<bundles_post_ra>
// kernel: rnn4_forward.1
= control target key start
LH: loop header
LB: loop body
LE: loop exit
PB: predicated region body
PF: predicated region fallthrough
CT: control target
= control target key end

     0   :  { %s942_s1 = inlined_call_operand.vmem [shape: bf16[128,256], index: 1, kind: input, shape index: {}]   ;;  %s943_s2 = inlined_call_operand.vmem [shape: f32[1,128], index: 2, kind: input, shape index: {}]   ;;  %s944_s0 = inlined_call_operand.vmem [shape: f32[8,128], index: 0, kind: input, shape index: {}]   ;;  %s945_s3 = inlined_call_operand.vmem [shape: f32[1,128], index: 3, kind: input, shape index: {}]   ;;  %s946_s4 = inlined_call_operand.vmem [shape: f32[8,8,128], index: 4, kind: output, shape index: {0}]   ;;  %s947_s5 = inlined_call_operand.vmem [shape: f32[8,128], index: 5, kind: output, shape index: {1}]  }
   0x1   :  { %v518_v0 = vld [vmem:[%s942_s1 + $0x70] sm:$0xf]  ;;  %v546_v1 = vld [vmem:[%s942_s1 + $0x74] sm:$0xf0]  ;;  %v510_v2 = vld [vmem:[%s942_s1 + $0x60] sm:$0xf] }
   0x2   :  { %v620_v3 = vor.u32 %v546_v1, %v518_v0  ;;  %v544_v4 = vld [vmem:[%s942_s1 + $0x64] sm:$0xf0]  ;;  %v502_v6 = vld [vmem:[%s942_s1 + $0x50] sm:$0xf]  ;;  %v542_v7 = vld [vmem:[%s942_s1 + $0x54] sm:$0xf0] }
   0x3   :  { %v626_v5 = vor.u32 %v544_v4, %v510_v2  ;;  %v545_v8 = vld [vmem:[%s942_s1 + $0x74] sm:$0xf]  ;;  %v520_v9 = vld [vmem:[%s942_s1 + $0x78] sm:$0xf0]  ;;  %v543_v10 = vld [vmem:[%s942_s1 + $0x64] sm:$0xf]  ;;  %v648_v12 = vor.u32 %v542_v7, %v502_v6 }
   0x4   :  { %125 = vmatpush.bf16.msra.mxu0 %v620_v3  ;;  %165 = vmatpush.bf16.msra.mxu2 %v620_v3  ;;  %v512_v11 = vld [vmem:[%s942_s1 + $0x68] sm:$0xf0]  ;;  %v650_v13 = vor.u32 %v545_v8, %v520_v9  ;;  %v494_v14 = vld [vmem:[%s942_s1 + $0x40] sm:$0xf]  ;;  %v540_v15 = vld [vmem:[%s942_s1 + $0x44] sm:$0xf0] }
   0x5   :  { %v661_v16 = vor.u32 %v543_v10, %v512_v11  ;;  %v541_v17 = vld [vmem:[%s942_s1 + $0x54] sm:$0xf]  ;;  %v504_v18 = vld [vmem:[%s942_s1 + $0x58] sm:$0xf0]  ;;  %v670_v19 = vor.u32 %v540_v15, %v494_v14  ;;  %v486_v20 = vld [vmem:[%s942_s1 + $0x30] sm:$0xf] }
   0x6   :  { %138 = vmatpush.bf16.msra.mxu1 %v650_v13  ;;  %178 = vmatpush.bf16.msra.mxu3 %v650_v13  ;;  %v538_v21 = vld [vmem:[%s942_s1 + $0x34] sm:$0xf0]  ;;  %v681_v22 = vor.u32 %v541_v17, %v504_v18  ;;  %v539_v23 = vld [vmem:[%s942_s1 + $0x44] sm:$0xf]  ;;  %v496_v24 = vld [vmem:[%s942_s1 + $0x48] sm:$0xf0] }
   0x7   :  { %v690_v25 = vor.u32 %v538_v21, %v486_v20  ;;  %v478_v26 = vld [vmem:[%s942_s1 + $0x20] sm:$0xf]  ;;  %v536_v27 = vld [vmem:[%s942_s1 + $0x24] sm:$0xf0]  ;;  %v701_v28 = vor.u32 %v539_v23, %v496_v24  ;;  %v537_v29 = vld [vmem:[%s942_s1 + $0x34] sm:$0xf] }
   0x8   :  { %126 = vmatpush.bf16.msra.mxu0 %v626_v5  ;;  %166 = vmatpush.bf16.msra.mxu2 %v626_v5  ;;  %v488_v30 = vld [vmem:[%s942_s1 + $0x38] sm:$0xf0]  ;;  %v710_v31 = vor.u32 %v536_v27, %v478_v26  ;;  %v470_v32 = vld [vmem:[%s942_s1 + $0x10] sm:$0xf]  ;;  %v534_v33 = vld [vmem:[%s942_s1 + $0x14] sm:$0xf0] }
   0x9   :  { %v721_v34 = vor.u32 %v537_v29, %v488_v30  ;;  %v535_v35 = vld [vmem:[%s942_s1 + $0x24] sm:$0xf]  ;;  %v480_v36 = vld [vmem:[%s942_s1 + $0x28] sm:$0xf0]  ;;  %v730_v37 = vor.u32 %v534_v33, %v470_v32  ;;  %v462_v38 = vld [vmem:[%s942_s1] sm:$0xf] }
   0xa   :  { %139 = vmatpush.bf16.msra.mxu1 %v661_v16  ;;  %179 = vmatpush.bf16.msra.mxu3 %v661_v16  ;;  %v532_v39 = vld [vmem:[%s942_s1 + $0x4] sm:$0xf0]  ;;  %v741_v40 = vor.u32 %v535_v35, %v480_v36  ;;  %v533_v41 = vld [vmem:[%s942_s1 + $0x14] sm:$0xf]  ;;  %v472_v42 = vld [vmem:[%s942_s1 + $0x18] sm:$0xf0] }
   0xb   :  { %v750_v43 = vor.u32 %v532_v39, %v462_v38  ;;  %v43_v44 = vld [vmem:[%s944_s0] sm:$0xff]  ;;  %v758_v45 = vor.u32 %v533_v41, %v472_v42  ;;  %v464_v48 = vld [vmem:[%s942_s1 + $0x8] sm:$0xf0] }
   0xc   :  { %127 = vmatpush.bf16.msra.mxu0 %v648_v12  ;;  %167 = vmatpush.bf16.msra.mxu2 %v648_v12  ;;  %v44_v46 = vpack.c.bf16 %v43_v44, %v43_v44  ;;  %v531_v47 = vld [vmem:[%s942_s1 + $0x4] sm:$0xf]  ;;  %v815_v50 = vld [vmem:[%s943_s2] ss:$0 sm:$0xff] }
   0xd   :  { %v794_v49 = vor.u32 %v531_v47, %v464_v48  ;;  %v847_v55 = vld [vmem:[%s945_s3] ss:$0 sm:$0xff] }
   0xe   :  { %140 = vmatpush.bf16.msra.mxu1 %v681_v22  ;;  %180 = vmatpush.bf16.msra.mxu3 %v681_v22 }
  0x10   :  { %128 = vmatpush.bf16.msra.mxu0 %v670_v19  ;;  %168 = vmatpush.bf16.msra.mxu2 %v670_v19 }
  0x12   :  { %141 = vmatpush.bf16.msra.mxu1 %v701_v28  ;;  %181 = vmatpush.bf16.msra.mxu3 %v701_v28 }
  0x14   :  { %129 = vmatpush.bf16.msra.mxu0 %v690_v25  ;;  %169 = vmatpush.bf16.msra.mxu2 %v690_v25 }
  0x16   :  { %142 = vmatpush.bf16.msra.mxu1 %v721_v34  ;;  %182 = vmatpush.bf16.msra.mxu3 %v721_v34 }
  0x18   :  { %130 = vmatpush.bf16.msra.mxu0 %v710_v31  ;;  %170 = vmatpush.bf16.msra.mxu2 %v710_v31 }
  0x1a   :  { %143 = vmatpush.bf16.msra.mxu1 %v741_v40  ;;  %183 = vmatpush.bf16.msra.mxu3 %v741_v40 }
  0x1c   :  { %131 = vmatpush.bf16.msra.mxu0 %v730_v37  ;;  %171 = vmatpush.bf16.msra.mxu2 %v730_v37 }
  0x1e   :  { %144 = vmatpush.bf16.msra.mxu1 %v758_v45  ;;  %184 = vmatpush.bf16.msra.mxu3 %v758_v45 }
  0x20   :  { %132 = vmatpush.bf16.msra.mxu0 %v750_v43  ;;  %172 = vmatpush.bf16.msra.mxu2 %v750_v43 }
  0x22   :  { %145 = vmatpush.bf16.msra.mxu1 %v794_v49  ;;  %185 = vmatpush.bf16.msra.mxu3 %v794_v49 }
  0x23   :  { %133 = vmatmul.bf16.vlgmr.msra.gmra.mxu0 %v44_v46 }
  0x24   :  { %206 = vmatpush.bf16.msrb.mxu0 %v620_v3  ;;  %247 = vmatpush.bf16.msrb.mxu2 %v620_v3 }
  0x25   :  { %146 = vmatmul.bf16.vlgmr.msra.gmra.mxu1 %v44_v46 }
  0x26   :  { %219 = vmatpush.bf16.msrb.mxu1 %v650_v13  ;;  %260 = vmatpush.bf16.msrb.mxu3 %v650_v13 }
  0x28   :  { %207 = vmatpush.bf16.msrb.mxu0 %v626_v5  ;;  %248 = vmatpush.bf16.msrb.mxu2 %v626_v5 }
  0x2a   :  { %220 = vmatpush.bf16.msrb.mxu1 %v661_v16  ;;  %261 = vmatpush.bf16.msrb.mxu3 %v661_v16 }
  0x2c   :  { %208 = vmatpush.bf16.msrb.mxu0 %v648_v12  ;;  %249 = vmatpush.bf16.msrb.mxu2 %v648_v12 }
  0x2e   :  { %221 = vmatpush.bf16.msrb.mxu1 %v681_v22  ;;  %262 = vmatpush.bf16.msrb.mxu3 %v681_v22 }
  0x30   :  { %209 = vmatpush.bf16.msrb.mxu0 %v670_v19  ;;  %250 = vmatpush.bf16.msrb.mxu2 %v670_v19 }
  0x32   :  { %222 = vmatpush.bf16.msrb.mxu1 %v701_v28  ;;  %263 = vmatpush.bf16.msrb.mxu3 %v701_v28 }
  0x34   :  { %210 = vmatpush.bf16.msrb.mxu0 %v690_v25  ;;  %251 = vmatpush.bf16.msrb.mxu2 %v690_v25 }
  0x36   :  { %223 = vmatpush.bf16.msrb.mxu1 %v721_v34  ;;  %264 = vmatpush.bf16.msrb.mxu3 %v721_v34 }
  0x38   :  { %211 = vmatpush.bf16.msrb.mxu0 %v710_v31  ;;  %252 = vmatpush.bf16.msrb.mxu2 %v710_v31 }
  0x3a   :  { %224 = vmatpush.bf16.msrb.mxu1 %v741_v40  ;;  %265 = vmatpush.bf16.msrb.mxu3 %v741_v40 }
  0x3c   :  { %212 = vmatpush.bf16.msrb.mxu0 %v730_v37  ;;  %253 = vmatpush.bf16.msrb.mxu2 %v730_v37 }
  0x3e   :  { %225 = vmatpush.bf16.msrb.mxu1 %v758_v45  ;;  %266 = vmatpush.bf16.msrb.mxu3 %v758_v45 }
  0x40   :  { %213 = vmatpush.bf16.msrb.mxu0 %v750_v43  ;;  %254 = vmatpush.bf16.msrb.mxu2 %v750_v43 }
  0x42   :  { %226 = vmatpush.bf16.msrb.mxu1 %v794_v49  ;;  %267 = vmatpush.bf16.msrb.mxu3 %v794_v49 }
  0x44   :  { %288 = vmatpush.bf16.msra.mxu0 %v620_v3 }
  0x46   :  { %301 = vmatpush.bf16.msra.mxu1 %v650_v13 }
  0x48   :  { %289 = vmatpush.bf16.msra.mxu0 %v626_v5 }
  0x4a   :  { %302 = vmatpush.bf16.msra.mxu1 %v661_v16 }
  0x4c   :  { %290 = vmatpush.bf16.msra.mxu0 %v648_v12 }
  0x4e   :  { %303 = vmatpush.bf16.msra.mxu1 %v681_v22 }
  0x50   :  { %291 = vmatpush.bf16.msra.mxu0 %v670_v19 }
  0x52   :  { %304 = vmatpush.bf16.msra.mxu1 %v701_v28 }
  0x54   :  { %292 = vmatpush.bf16.msra.mxu0 %v690_v25 }
  0x56   :  { %305 = vmatpush.bf16.msra.mxu1 %v721_v34 }
  0x58   :  { %293 = vmatpush.bf16.msra.mxu0 %v710_v31 }
  0x5a   :  { %306 = vmatpush.bf16.msra.mxu1 %v741_v40 }
  0x5c   :  { %294 = vmatpush.bf16.msra.mxu0 %v730_v37 }
  0x5e   :  { %307 = vmatpush.bf16.msra.mxu1 %v758_v45 }
  0x60   :  { %295 = vmatpush.bf16.msra.mxu0 %v750_v43 }
  0x62   :  { %308 = vmatpush.bf16.msra.mxu1 %v794_v49 }
  0xa0   :  { %v134_v51 = vpop.f32.mrf.mxu0 }
  0xa1   :  { %v151_v52 = vadd.f32 %v815_v50, %v134_v51 }
  0xa2   :  { %v147_v56 = vpop.f32.mrf.mxu1 }
  0xa3   :  { %v164_v53 = vpack.c.bf16 %v151_v52, %v151_v52  ;;  %v850_v57 = vadd.f32 %v847_v55, %v147_v56 }
  0xa5   :  { %173 = vmatmul.bf16.vlgmr.msra.gmra.mxu2 %v164_v53  ;;  %186 = vmatmul.bf16.vlgmr.msra.gmra.mxu3 %v164_v53 }
  0xa6   :  { %329 = vmatpush.bf16.msra.mxu2 %v620_v3  ;;  %342 = vmatpush.bf16.msra.mxu3 %v650_v13 }
  0xa7   :  { %153 = vmax.xlane.f32.xlu0 %v850_v57 }
  0xa8   :  { %v136_v54 = vpop.f32.mrf.mxu0 }
  0xaa   :  { %330 = vmatpush.bf16.msra.mxu2 %v626_v5  ;;  %343 = vmatpush.bf16.msra.mxu3 %v661_v16  ;;  %v149_v58 = vpop.f32.mrf.mxu1 }
  0xae   :  { %331 = vmatpush.bf16.msra.mxu2 %v648_v12  ;;  %344 = vmatpush.bf16.msra.mxu3 %v681_v22 }
  0xb2   :  { %332 = vmatpush.bf16.msra.mxu2 %v670_v19  ;;  %345 = vmatpush.bf16.msra.mxu3 %v701_v28 }
  0xb6   :  { %333 = vmatpush.bf16.msra.mxu2 %v690_v25  ;;  %346 = vmatpush.bf16.msra.mxu3 %v721_v34 }
  0xba   :  { %334 = vmatpush.bf16.msra.mxu2 %v710_v31  ;;  %347 = vmatpush.bf16.msra.mxu3 %v741_v40 }
  0xbe   :  { %335 = vmatpush.bf16.msra.mxu2 %v730_v37  ;;  %348 = vmatpush.bf16.msra.mxu3 %v758_v45 }
  0xc2   :  { %336 = vmatpush.bf16.msra.mxu2 %v750_v43  ;;  %349 = vmatpush.bf16.msra.mxu3 %v794_v49 }
 0x11a   :  { %v154_v23 = vpop.xlane.xlu0 %153 }
 0x128   :  { %v174_v59 = vpop.f32.mrf.mxu2  ;;  %v187_v60 = vpop.f32.mrf.mxu3 }
 0x129   :  { %v191_v61 = vadd.f32 %v815_v50, %v174_v59  ;;  %v855_v62 = vadd.f32 %v847_v55, %v187_v60 }
 0x12b   :  { %v205_v63 = vpack.c.bf16 %v191_v61, %v191_v61  ;;  %193 = vmax.xlane.f32.xlu0 %v855_v62 }
 0x12d   :  { %214 = vmatmul.bf16.vlgmr.msrb.gmra.mxu0 %v205_v63  ;;  %227 = vmatmul.bf16.vlgmr.msrb.gmra.mxu1 %v205_v63 }
 0x12e   :  { %370 = vmatpush.bf16.msrb.mxu0 %v620_v3  ;;  %383 = vmatpush.bf16.msrb.mxu1 %v650_v13 }
 0x130   :  { %v176_v0 = vpop.f32.mrf.mxu2  ;;  %v189_v1 = vpop.f32.mrf.mxu3 }
 0x132   :  { %371 = vmatpush.bf16.msrb.mxu0 %v626_v5  ;;  %384 = vmatpush.bf16.msrb.mxu1 %v661_v16 }
 0x136   :  { %372 = vmatpush.bf16.msrb.mxu0 %v648_v12  ;;  %385 = vmatpush.bf16.msrb.mxu1 %v681_v22 }
 0x13a   :  { %373 = vmatpush.bf16.msrb.mxu0 %v670_v19  ;;  %386 = vmatpush.bf16.msrb.mxu1 %v701_v28 }
 0x13e   :  { %374 = vmatpush.bf16.msrb.mxu0 %v690_v25  ;;  %387 = vmatpush.bf16.msrb.mxu1 %v721_v34 }
 0x142   :  { %375 = vmatpush.bf16.msrb.mxu0 %v710_v31  ;;  %388 = vmatpush.bf16.msrb.mxu1 %v741_v40 }
 0x146   :  { %376 = vmatpush.bf16.msrb.mxu0 %v730_v37  ;;  %389 = vmatpush.bf16.msrb.mxu1 %v758_v45 }
 0x14a   :  { %377 = vmatpush.bf16.msrb.mxu0 %v750_v43  ;;  %390 = vmatpush.bf16.msrb.mxu1 %v794_v49 }
 0x19e   :  { %v194_v41 = vpop.xlane.xlu0 %193 }
 0x19f   :  { %v195_v42 = vsub.f32 %v855_v62, %v194_v41 }
 0x1a1   :  { %v196_v44 = vmul.f32 1.442695, %v195_v42 }
 0x1aa   :  { %v215_v2 = vpop.f32.mrf.mxu0  ;;  %v228_v4 = vpop.f32.mrf.mxu1 }
 0x1ab   :  { %v232_v6 = vadd.f32 %v815_v50, %v215_v2  ;;  %v876_v7 = vadd.f32 %v847_v55, %v228_v4 }
 0x1ad   :  { %v246_v8 = vpack.c.bf16 %v232_v6, %v232_v6  ;;  %234 = vmax.xlane.f32.xlu1 %v876_v7 }
 0x1af   :  { %255 = vmatmul.bf16.vlgmr.msrb.gmra.mxu2 %v246_v8  ;;  %268 = vmatmul.bf16.vlgmr.msrb.gmra.mxu3 %v246_v8 }
 0x1b0   :  { %411 = vmatpush.bf16.msrb.mxu2 %v620_v3  ;;  %424 = vmatpush.bf16.msrb.mxu3 %v650_v13 }
 0x1b2   :  { %v217_v9 = vpop.f32.mrf.mxu0  ;;  %v230_v10 = vpop.f32.mrf.mxu1 }
 0x1b4   :  { %412 = vmatpush.bf16.msrb.mxu2 %v626_v5  ;;  %425 = vmatpush.bf16.msrb.mxu3 %v661_v16 }
 0x1b8   :  { %413 = vmatpush.bf16.msrb.mxu2 %v648_v12  ;;  %426 = vmatpush.bf16.msrb.mxu3 %v681_v22 }
 0x1bc   :  { %414 = vmatpush.bf16.msrb.mxu2 %v670_v19  ;;  %427 = vmatpush.bf16.msrb.mxu3 %v701_v28 }
 0x1c0   :  { %415 = vmatpush.bf16.msrb.mxu2 %v690_v25  ;;  %428 = vmatpush.bf16.msrb.mxu3 %v721_v34  ;;  %v155_v25 = vsub.f32 %v850_v57, %v154_v23 }
 0x1c2   :  { %v156_v26 = vmul.f32 1.442695, %v155_v25 }
 0x1c4   :  { %416 = vmatpush.bf16.msrb.mxu2 %v710_v31  ;;  %429 = vmatpush.bf16.msrb.mxu3 %v741_v40  ;;  %549 = vpow2.f32 %v156_v26 }
 0x1c8   :  { %417 = vmatpush.bf16.msrb.mxu2 %v730_v37  ;;  %430 = vmatpush.bf16.msrb.mxu3 %v758_v45 }
 0x1ca   :  { %v550_v34 = vpop.eup %549 }
 0x1cc   :  { %418 = vmatpush.bf16.msrb.mxu2 %v750_v43  ;;  %431 = vmatpush.bf16.msrb.mxu3 %v794_v49 }
 0x220   :  { %v899_v24 = vpop.xlane.xlu1 %234 }
 0x221   :  { %v236_v9 = vsub.f32 %v876_v7, %v899_v24 }
 0x232   :  { %v256_v3 = vpop.f32.mrf.mxu2  ;;  %v269_v5 = vpop.f32.mrf.mxu3 }
 0x233   :  { %v273_v11 = vadd.f32 %v815_v50, %v256_v3  ;;  %v274_v12 = vadd.f32 %v847_v55, %v269_v5 }
 0x235   :  { %v287_v13 = vpack.c.bf16 %v273_v11, %v273_v11  ;;  %275 = vmax.xlane.f32.xlu1 %v274_v12  ;;  %v237_v11 = vmul.f32 1.442695, %v236_v9 }
 0x237   :  { %296 = vmatmul.bf16.vlgmr.msra.gmra.mxu0 %v287_v13  ;;  %309 = vmatmul.bf16.vlgmr.msra.gmra.mxu1 %v287_v13 }
 0x23a   :  { %v258_v14 = vpop.f32.mrf.mxu2  ;;  %v271_v15 = vpop.f32.mrf.mxu3 }
 0x2a8   :  { %v276_v29 = vpop.xlane.xlu1 %275 }
 0x2a9   :  { %v277_v33 = vsub.f32 %v274_v12, %v276_v29 }
 0x2ab   :  { %v278_v35 = vmul.f32 1.442695, %v277_v33 }
 0x2ad   :  { %551 = vpow2.f32 %v278_v35 }
 0x2b3   :  { %v552_v38 = vpop.eup %551 }
 0x2b4   :  { %v297_v16 = vpop.f32.mrf.mxu0  ;;  %v310_v17 = vpop.f32.mrf.mxu1 }
 0x2b5   :  { %v314_v18 = vadd.f32 %v815_v50, %v297_v16  ;;  %v315_v19 = vadd.f32 %v847_v55, %v310_v17 }
 0x2b7   :  { %v328_v20 = vpack.c.bf16 %v314_v18, %v314_v18  ;;  %316 = vmax.xlane.f32.xlu2 %v315_v19 }
 0x2b9   :  { %337 = vmatmul.bf16.vlgmr.msra.gmra.mxu2 %v328_v20  ;;  %350 = vmatmul.bf16.vlgmr.msra.gmra.mxu3 %v328_v20 }
 0x2bc   :  { %v299_v21 = vpop.f32.mrf.mxu0  ;;  %v312_v22 = vpop.f32.mrf.mxu1 }
 0x32a   :  { %v317_v39 = vpop.xlane.xlu2 %316 }
 0x32b   :  { %v318_v52 = vsub.f32 %v315_v19, %v317_v39 }
 0x32d   :  { %v319_v57 = vmul.f32 1.442695, %v318_v52 }
 0x33c   :  { %v338_v27 = vpop.f32.mrf.mxu2  ;;  %v351_v28 = vpop.f32.mrf.mxu3 }
 0x33d   :  { %v355_v30 = vadd.f32 %v815_v50, %v338_v27  ;;  %v904_v31 = vadd.f32 %v847_v55, %v351_v28 }
 0x33f   :  { %v369_v32 = vpack.c.bf16 %v355_v30, %v355_v30  ;;  %357 = vmax.xlane.f32.xlu2 %v904_v31 }
 0x341   :  { %378 = vmatmul.bf16.vlgmr.msrb.gmra.mxu0 %v369_v32  ;;  %391 = vmatmul.bf16.vlgmr.msrb.gmra.mxu1 %v369_v32 }
 0x344   :  { %v340_v36 = vpop.f32.mrf.mxu2  ;;  %v353_v37 = vpop.f32.mrf.mxu3 }
 0x347   :  { %158 = vadd.xlane.f32.xlu2 %v550_v34 }
 0x34f   :  { %280 = vadd.xlane.f32.xlu2 %v552_v38 }
 0x3b2   :  { %v358_v40 = vpop.xlane.xlu2 %357 }
 0x3b3   :  { %v359_v7 = vsub.f32 %v904_v31, %v358_v40 }
 0x3b5   :  { %v360_v19 = vmul.f32 1.442695, %v359_v7 }
 0x3ba   :  { %v159_v43 = vpop.xlane.xlu2 %158 }
 0x3bb   :  { %553 = vlog2.f32 %v159_v43 }
 0x3bc   :  { %555 = vpow2.f32 %v196_v44 }
 0x3be   :  { %v379_v45 = vpop.f32.mrf.mxu0  ;;  %v392_v46 = vpop.f32.mrf.mxu1 }
 0x3bf   :  { %v396_v47 = vadd.f32 %v815_v50, %v379_v45  ;;  %v397_v48 = vadd.f32 %v847_v55, %v392_v46 }
 0x3c1   :  { %v554_v49 = vpop.eup %553  ;;  %v410_v51 = vpack.c.bf16 %v396_v47, %v396_v47  ;;  %398 = vmax.xlane.f32.xlu0 %v397_v48 }
 0x3c2   :  { %v161_v53 = vmul.f32 0.6931472, %v554_v49  ;;  %v281_v54 = vpop.xlane.xlu2 %280  ;;  %v556_v60 = vpop.eup %555 }
 0x3c3   :  { %557 = vlog2.f32 %v281_v54  ;;  %419 = vmatmul.bf16.vlgmr.msrb.gmra.mxu2 %v410_v51  ;;  %432 = vmatmul.bf16.vlgmr.msrb.gmra.mxu3 %v410_v51 }
 0x3c4   :  { %v162_v56 = vsub.f32 %v155_v25, %v161_v53  ;;  %559 = vpow2.f32 %v319_v57 }
 0x3c6   :  { %163 = vst [vmem:[%s946_s4] sm:$0xff] %v162_v56  ;;  %v381_v58 = vpop.f32.mrf.mxu0  ;;  %v394_v59 = vpop.f32.mrf.mxu1 }
 0x3c9   :  { %v558_v61 = vpop.eup %557  ;;  %198 = vadd.xlane.f32.xlu0 %v556_v60 }
 0x3ca   :  { %v283_v62 = vmul.f32 0.6931472, %v558_v61  ;;  %v560_v0 = vpop.eup %559 }
 0x3cc   :  { %v284_v63 = vsub.f32 %v277_v33, %v283_v62 }
 0x3ce   :  { %526 = vst [vmem:[%s946_s4 + $0x18] sm:$0xff] %v284_v63 }
 0x3d1   :  { %321 = vadd.xlane.f32.xlu0 %v560_v0 }
 0x434   :  { %v399_v1 = vpop.xlane.xlu0 %398 }
 0x435   :  { %v400_v2 = vsub.f32 %v397_v48, %v399_v1 }
 0x437   :  { %v401_v4 = vmul.f32 1.442695, %v400_v2 }
 0x439   :  { %561 = vpow2.f32 %v401_v4 }
 0x43c   :  { %v199_v6 = vpop.xlane.xlu0 %198 }
 0x43d   :  { %563 = vlog2.f32 %v199_v6 }
 0x43f   :  { %v562_v8 = vpop.eup %561 }
 0x440   :  { %403 = vadd.xlane.f32.xlu2 %v562_v8 }
 0x443   :  { %v564_v10 = vpop.eup %563 }
 0x444   :  { %v201_v3 = vmul.f32 0.6931472, %v564_v10  ;;  %v322_v5 = vpop.xlane.xlu0 %321 }
 0x445   :  { %565 = vlog2.f32 %v322_v5 }
 0x446   :  { %v202_v12 = vsub.f32 %v195_v42, %v201_v3  ;;  %v420_v13 = vpop.f32.mrf.mxu2  ;;  %v433_v14 = vpop.f32.mrf.mxu3  ;;  %567 = vpow2.f32 %v237_v11 }
 0x447   :  { %v437_v15 = vadd.f32 %v815_v50, %v420_v13  ;;  %v438_v16 = vadd.f32 %v847_v55, %v433_v14  ;;  %569 = vpow2.f32 %v360_v19 }
 0x448   :  { %524 = vst [vmem:[%s946_s4 + $0x8] sm:$0xff] %v202_v12 }
 0x449   :  { %451 = vst [vmem:[%s947_s5] sm:$0xff] %v437_v15  ;;  %439 = vmax.xlane.f32.xlu1 %v438_v16 }
 0x44b   :  { %v566_v17 = vpop.eup %565 }
 0x44c   :  { %v324_v18 = vmul.f32 0.6931472, %v566_v17  ;;  %v568_v22 = vpop.eup %567 }
 0x44d   :  { %v570_v55 = vpop.eup %569 }
 0x44e   :  { %v325_v20 = vsub.f32 %v318_v52, %v324_v18  ;;  %v422_v21 = vpop.f32.mrf.mxu2  ;;  %v435_v50 = vpop.f32.mrf.mxu3 }
 0x450   :  { %527 = vst [vmem:[%s946_s4 + $0x20] sm:$0xff] %v325_v20 }
 0x451   :  { %239 = vadd.xlane.f32.xlu1 %v568_v22 }
 0x459   :  { %362 = vadd.xlane.f32.xlu1 %v570_v55 }
 0x4b3   :  { %v404_v23 = vpop.xlane.xlu2 %403 }
 0x4b4   :  { %571 = vlog2.f32 %v404_v23 }
 0x4ba   :  { %v572_v24 = vpop.eup %571 }
 0x4bb   :  { %v406_v25 = vmul.f32 0.6931472, %v572_v24 }
 0x4bc   :  { %v440_v26 = vpop.xlane.xlu1 %439 }
 0x4bd   :  { %v407_v27 = vsub.f32 %v400_v2, %v406_v25  ;;  %v441_v28 = vsub.f32 %v438_v16, %v440_v26 }
 0x4bf   :  { %529 = vst [vmem:[%s946_s4 + $0x30] sm:$0xff] %v407_v27  ;;  %v442_v29 = vmul.f32 1.442695, %v441_v28 }
 0x4c1   :  { %573 = vpow2.f32 %v442_v29 }
 0x4c4   :  { %v240_v30 = vpop.xlane.xlu1 %239 }
 0x4c5   :  { %575 = vlog2.f32 %v240_v30 }
 0x4c7   :  { %v574_v31 = vpop.eup %573 }
 0x4c8   :  { %444 = vadd.xlane.f32.xlu0 %v574_v31 }
 0x4cb   :  { %v576_v32 = vpop.eup %575 }
 0x4cc   :  { %v242_v33 = vmul.f32 0.6931472, %v576_v32  ;;  %v363_v34 = vpop.xlane.xlu1 %362 }
 0x4cd   :  { %577 = vlog2.f32 %v363_v34 }
 0x4ce   :  { %v243_v35 = vsub.f32 %v236_v9, %v242_v33 }
 0x4d0   :  { %525 = vst [vmem:[%s946_s4 + $0x10] sm:$0xff] %v243_v35 }
 0x4d3   :  { %v578_v36 = vpop.eup %577 }
 0x4d4   :  { %v365_v37 = vmul.f32 0.6931472, %v578_v36 }
 0x4d6   :  { %v366_v38 = vsub.f32 %v359_v7, %v365_v37 }
 0x4d8   :  { %528 = vst [vmem:[%s946_s4 + $0x28] sm:$0xff] %v366_v38 }
 0x53b   :  { %v445_v39 = vpop.xlane.xlu0 %444 }
 0x53c   :  { %579 = vlog2.f32 %v445_v39 }
 0x542   :  { %v580_v40 = vpop.eup %579 }
 0x543   :  { %v447_v41 = vmul.f32 0.6931472, %v580_v40 }
 0x545   :  { %v448_v42 = vsub.f32 %v441_v28, %v447_v41 }
 0x547   :  { %530 = vst [vmem:[%s946_s4 + $0x38] sm:$0xff] %v448_v42 }

</bundles_post_ra>
